<compile_context>
chip_gen: v7x
topology: tpu7x:2x2x1
jax: 0.10.0
libtpu: 0.0.40
codegen_flags: <defaults>
</compile_context>

<pallas_src>
import jax
import jax.numpy as jnp
from jax.experimental import pallas as pl
from jax.experimental.pallas import tpu as pltpu


# ---------------------------------------------------------------------------
# Generation-aware sizing
# ---------------------------------------------------------------------------
def _physical_vmem_bytes():
    try:
        info = pltpu.get_tpu_info()
        v = int(getattr(info, "vmem_capacity_bytes", 0) or 0)
        if v > 0:
            return v
    except Exception:
        pass
    return 64 * 1024 * 1024  # conservative default (v7x per-TensorCore)


_VMEM_PHYS = _physical_vmem_bytes()

# Per-block byte target.  In + out, double-buffered => 4 resident blocks;
# budget ~half of physical VMEM for them and clamp to [2 MiB, 8 MiB]:
#   v7x (64 MiB VMEM)      -> 8 MiB blocks
#   v5e/v6e (128 MiB VMEM) -> 8 MiB blocks
_BLOCK_BYTES = max(2 << 20, min(8 << 20, _VMEM_PHYS // 8))

# Raise the scoped-VMEM limit above the defaults (16 MiB v5e / 32 MiB v6e,v7x)
# so the large double-buffered blocks fit; never above 3/4 of physical VMEM.
_VMEM_LIMIT = int(min(48 << 20, (_VMEM_PHYS * 3) // 4))

# Widest lane-dense last dims to try on the fast path (wider => unmasked full
# `vst` stores and fewer DMA descriptors per block).
_LANE_CANDIDATES = (1024, 512, 256, 128)


def _make_elementwise_kernel(func):
    def kernel(x_ref, o_ref):
        # On v5e one could upcast bf16 -> f32 here explicitly (no native bf16
        # VPU/EUP); still mem-bound either way, so we keep the input dtype.
        o_ref[...] = func(x_ref[...]).astype(o_ref.dtype)
    return kernel


def _launch_2d(kernel, x2d, out_dtype, *, flops_pe, trans_pe, alias):
    """Stream a 2D slab through `kernel`, blocked along the row (sublane) axis."""
    rows, cols = x2d.shape
    in_item = jnp.dtype(x2d.dtype).itemsize
    out_item = jnp.dtype(out_dtype).itemsize

    # Rows per block targeting _BLOCK_BYTES of input; 32-sublane aligned so any
    # dtype's packed tiling is happy.
    target_rows = _BLOCK_BYTES // max(1, cols * in_item)
    target_rows = max(32, (target_rows // 32) * 32)

    if rows < 64:
        block_rows = rows  # full-extent block along rows -> always legal
    else:
        # Guarantee >= 2 grid steps so both v7x TensorCores get work, capped by
        # the VMEM byte target.  Ragged last row-block is handled by Pallas.
        half = max(32, ((rows // 2) // 32) * 32)
        block_rows = min(target_rows, half)
    grid_rows = pl.cdiv(rows, block_rows)

    n = rows * cols
    cost = pl.CostEstimate(
        flops=flops_pe * n,
        transcendentals=trans_pe * n,
        bytes_accessed=n * (in_item + out_item),
    )

    # NOTE: pipeline_mode=pl.Buffered(3) on in_specs is a possible further
    # sweep once blocks are this large; left at the default depth-2 here.
    call = pl.pallas_call(
        kernel,
        out_shape=jax.ShapeDtypeStruct((rows, cols), out_dtype),
        grid=(grid_rows,),
        in_specs=[pl.BlockSpec((block_rows, cols), lambda i: (i, 0))],
        out_specs=pl.BlockSpec((block_rows, cols), lambda i: (i, 0)),
        compiler_params=pltpu.CompilerParams(
            dimension_semantics=("parallel",),
            vmem_limit_bytes=_VMEM_LIMIT,
        ),
        cost_estimate=cost,
        input_output_aliases=({0: 0} if alias else {}),
    )
    return call(x2d)


def pallas_lambda(func, *, flops_per_element=3, transcendentals_per_element=1,
                  donate_input=False):
    """Return a callable equivalent to Lambda(func).forward.

    `func` must be a JAX-traceable, elementwise callable (e.g. an activation)
    for the Pallas path.  Non-shape-preserving funcs fall back to plain JAX so
    Lambda(func) semantics are preserved.  Set donate_input=True (and donate
    the argument at the jit boundary) to alias the output onto the input.
    """
    kernel = _make_elementwise_kernel(func)

    def apply(x):
        x = jnp.asarray(x)
        orig_shape = x.shape
        n = x.size
        if n == 0:
            return func(x)

        # Infer output dtype abstractly (dtype-changing funcs keep their dtype)
        # and detect gross non-elementwise funcs by their shape change.
        try:
            out_abs = jax.eval_shape(func, jax.ShapeDtypeStruct(x.shape, x.dtype))
            out_dtype, out_shape_abs = out_abs.dtype, out_abs.shape
        except Exception:
            out_dtype, out_shape_abs = x.dtype, orig_shape
        if tuple(out_shape_abs) != tuple(orig_shape):
            # TODO(synk): non-shape-preserving funcs (reductions, matmuls, ...)
            # cannot be expressed as a generic blocked elementwise kernel; fall
            # back to plain JAX to preserve Lambda(func) semantics.
            return func(x)

        in_item = jnp.dtype(x.dtype).itemsize
        out_item = jnp.dtype(out_dtype).itemsize
        alias = bool(donate_input) and (jnp.dtype(out_dtype) == jnp.dtype(x.dtype))

        # ---- Fast path: element count divides a lane-dense width ----------
        if n % 128 == 0:
            lane = next(c for c in _LANE_CANDIDATES if n % c == 0)
            out2d = _launch_2d(kernel, x.reshape(n // lane, lane), out_dtype,
                               flops_pe=flops_per_element,
                               trans_pe=transcendentals_per_element,
                               alias=alias)
            return out2d.reshape(orig_shape)

        # ---- Ragged path (rare): no pad / slice HBM passes -----------------
        # Collapse leading dims, keep the original last dim; block over rows
        # only (full last dim => always a legal BlockSpec).  HBM traffic stays
        # 1x; lane utilisation is last_dim / ceil128(last_dim).
        if x.ndim <= 1:
            x2d = x.reshape(1, n)
        else:
            last = orig_shape[-1]
            x2d = x.reshape(n // last, last)
        rows2, cols2 = x2d.shape
        min_block_rows = rows2 if rows2 < 64 else 32
        if 2 * min_block_rows * cols2 * (in_item + out_item) <= 4 * _BLOCK_BYTES:
            out2d = _launch_2d(kernel, x2d, out_dtype,
                               flops_pe=flops_per_element,
                               trans_pe=transcendentals_per_element,
                               alias=alias)
            return out2d.reshape(orig_shape)

        # TODO(synk): pathological ragged case (huge ragged last row that does
        # not fit a VMEM block): keep the single-pad fallback (one extra HBM
        # read+write pass).  Padded tail goes through `func`; results are
        # discarded, but funcs undefined at 0 (log, 1/x) will produce NaN/Inf
        # in the discarded lanes.
        lane = 128
        rows = pl.cdiv(n, lane)
        flat = jnp.pad(x.reshape(-1), (0, rows * lane - n))
        out2d = _launch_2d(kernel, flat.reshape(rows, lane), out_dtype,
                           flops_pe=flops_per_element,
                           trans_pe=transcendentals_per_element,
                           alias=False)
        return out2d.reshape(-1)[:n].reshape(orig_shape)

    return apply


if __name__ == "__main__":
    # func used by this Lambda instance (elementwise SiLU), representative of
    # how Lambda layers are used in residual blocks.
    func = lambda x: x * jax.nn.sigmoid(x)
    lambda_layer = pallas_lambda(func)

    key = jax.random.PRNGKey(0)
    k0, k1, k2 = jax.random.split(key, 3)

    # 1) Small NCHW input (primary check, fast lane-dense path).
    x = jax.random.normal(k0, (2, 4, 16, 16), dtype=jnp.float32)
    y = jax.block_until_ready(lambda_layer(x))
    assert y.shape == x.shape and y.dtype == x.dtype
    assert jnp.allclose(y, func(x), atol=1e-6, rtol=1e-6)

    # 2) Larger input: exercises the ~8 MiB blocks, the raised vmem limit and
    #    the >= 2 parallel grid steps (both v7x TensorCores).
    xl = jax.random.normal(k1, (4, 64, 128, 128), dtype=jnp.float32)
    yl = jax.block_until_ready(lambda_layer(xl))
    assert yl.shape == xl.shape
    assert jnp.allclose(yl, func(xl), atol=1e-5, rtol=1e-5)

    # 3) Ragged element count (105 elements): pad-free ragged path.
    xr = jax.random.normal(k2, (3, 5, 7), dtype=jnp.float32)
    yr = jax.block_until_ready(lambda_layer(xr))
    assert yr.shape == xr.shape
    assert jnp.allclose(yr, func(xr), atol=1e-6, rtol=1e-6)

    print("KERNEL_OK")
</pallas_src>

<mosaic_0001>
module attributes {stable_mosaic.version = 11 : i64} {
  func.func @kernel(%arg0: i32, %arg1: memref<2x1024xf32, #tpu.memory_space<vmem>>, %arg2: memref<2x1024xf32, #tpu.memory_space<vmem>>) attributes {dimension_semantics = [#tpu.dimension_semantics<parallel>], iteration_bounds = array<i64: 1>, scalar_prefetch = 0 : i64, scratch_operands = 0 : i64, tpu.core_type = #tpu.core_type<tc>, window_params = [{transform_indices = @transform_0, window_bounds = array<i64: 2, 1024>}, {transform_indices = @transform_1, window_bounds = array<i64: 2, 1024>}]} {
    %c0 = arith.constant 0 : index
    %c0_0 = arith.constant 0 : index
    %0 = vector.load %arg1[%c0, %c0_0] : memref<2x1024xf32, #tpu.memory_space<vmem>>, vector<2x1024xf32>
    %1 = arith.negf %0 : vector<2x1024xf32>
    %2 = math.exp %1 : vector<2x1024xf32>
    %cst = arith.constant 1.000000e+00 : f32
    %3 = vector.broadcast %cst : f32 to vector<2x1024xf32>
    %4 = arith.addf %3, %2 : vector<2x1024xf32>
    %5 = arith.divf %3, %4 : vector<2x1024xf32>
    %6 = arith.mulf %0, %5 : vector<2x1024xf32>
    %c0_1 = arith.constant 0 : index
    %c0_2 = arith.constant 0 : index
    %7 = vector.load %arg2[%c0_1, %c0_2] : memref<2x1024xf32, #tpu.memory_space<vmem>>, vector<2x1024xf32>
    tpu.vector_store %arg2[%c0_1, %c0_2], %6 {strides = array<i32>} : memref<2x1024xf32, #tpu.memory_space<vmem>>, vector<2x1024xf32>,
    return
  }
  func.func @transform_0(%arg0: i32) -> (i32, i32) {
    %c0_i32 = arith.constant 0 : i32
    %c0_i32_0 = arith.constant 0 : i32
    return %arg0, %c0_i32 : i32, i32
  }
  func.func @transform_1(%arg0: i32) -> (i32, i32) {
    %c0_i32 = arith.constant 0 : i32
    %c0_i32_0 = arith.constant 0 : i32
    return %arg0, %c0_i32 : i32, i32
  }
}

</mosaic_0001>

<bundles_post_ra>
// kernel: tpu_custom_call.1
= control target key start
LH: loop header
LB: loop body
LE: loop exit
PB: predicated region body
PF: predicated region fallthrough
CT: control target
= control target key end

     0   :  { %6 = vsyncpa [#allocation3], 0  ;;  %s150_s0 = inlined_call_operand.hbm [shape: f32[2,1024], index: 0, kind: input, shape index: {}]   ;;  %s151_s1 = inlined_call_operand.hbm [shape: f32[2,1024], index: 1, kind: output, shape index: {}]  }
   0x1   :  { %7 = vsyncpa [#allocation4], 0  ;;  %s114_s6 = smov [#allocation2]   ;;  %s66_s10 = scalar_lea.hbm %s150_s0, 256 }
   0x2   :  { %s14_s7 = sshll.u32 %s114_s6, 4  ;;  %p67_p0 = scmp.ne.s32.totalorder %s150_s0, %s66_s10  ;;  %s15_s7 = int_to_ptr.vmem [resolvable:$true] %s14_s7 }
   0x3   :  { %p70_p1 = scmp.lt.u32.totalorder %s66_s10, %s150_s0 }
   0x5   :  { %p72_p2 = pnand %p70_p1, %p67_p0 }
   0x7   :  { %75 = shalt.err (!%p72_p2)
}
   0x8   :  { %s76_s15 = scalar_lea.vmem %s15_s7, 256  ;;  %p81_p4 = scmp.lt.s32.totalorder %s15_s7, %s15_s7 }
   0x9   :  { %p77_p3 = scmp.ne.s32.totalorder %s15_s7, %s76_s15  ;;  %p82_p5 = scmp.lt.s32.totalorder %s76_s15, %s76_s15 }
   0xb   :  { %p83_p6 = por %p82_p5, %p81_p4 }
   0xd   :  { %p84_p7 = pnand %p83_p6, %p77_p3 }
   0xf   :  { %87 = shalt.err (!%p84_p7)
}
  0x10   :  { %17 = dma.hbm_to_vmem [thread:$0]  %s150_s0, 256, %s15_s7, [#allocation3]  }
  0x11   :  { %110 = dma.done.wait [#allocation3], 256  }
  0x12   :  { %111 = vsyncadd [#allocation3], 4294967040  ;;  %v21_v0 = vld [vmem:[#allocation2] sm:$0xff]  ;;  %v22_v1 = vld [vmem:[#allocation2 + $0x8] sm:$0xff]  ;;  %s115_s18 = smov [#allocation5]  }
  0x13   :  { %v54_v2 = vmul.f32 -1.442695, %v21_v0  ;;  %v55_v3 = vmul.f32 -1.442695, %v22_v1  ;;  %s45_s19 = sshll.u32 %s115_s18, 4  ;;  %s46_s19 = int_to_ptr.vmem [resolvable:$true] %s45_s19 }
  0x14   :  { %s88_s0 = scalar_lea.vmem %s46_s19, 256  ;;  %p93_p9 = scmp.lt.s32.totalorder %s46_s19, %s46_s19 }
  0x15   :  { %58 = vpow2.f32 %v54_v2  ;;  %p89_p8 = scmp.ne.s32.totalorder %s46_s19, %s88_s0  ;;  %p94_p10 = scmp.lt.s32.totalorder %s88_s0, %s88_s0 }
  0x16   :  { %60 = vpow2.f32 %v55_v3 }
  0x17   :  { %p95_p11 = por %p94_p10, %p93_p9 }
  0x19   :  { %p96_p12 = pnand %p95_p11, %p89_p8 }
  0x1f   :  { %v59_v4 = vpop.eup %58 }
  0x20   :  { %v61_v5 = vpop.eup %60  ;;  %v29_v6 = vadd.f32 1.0, %v59_v4 }
  0x21   :  { %v30_v7 = vadd.f32 1.0, %v61_v5 }
  0x22   :  { %62 = vrcp.f32 %v29_v6 }
  0x23   :  { %64 = vrcp.f32 %v30_v7 }
  0x2c   :  { %v63_v8 = vpop.eup %62 }
  0x2d   :  { %v65_v9 = vpop.eup %64  ;;  %v35_v10 = vmul.f32 %v63_v8, %v21_v0 }
  0x2e   :  { %v36_v11 = vmul.f32 %v65_v9, %v22_v1 }
  0x2f   :  { %37 = vst [vmem:[#allocation5] sm:$0xff] %v35_v10 }
  0x30   :  { %38 = vst [vmem:[#allocation5 + $0x8] sm:$0xff] %v36_v11 }
  0x31   :  { %99 = shalt.err (!%p96_p12)
}
  0x32   :  { %s100_s22 = scalar_lea.hbm %s151_s1, 256 }
  0x33   :  { %p101_p13 = scmp.ne.s32.totalorder %s151_s1, %s100_s22  ;;  %p104_p0 = scmp.lt.u32.totalorder %s100_s22, %s151_s1 }
  0x35   :  { %p106_p1 = pnand %p104_p0, %p101_p13 }
  0x37   :  { %109 = shalt.err (!%p106_p1)
}
  0x38   :  { %48 = dma.vmem_to_hbm [thread:$0]  %s46_s19, 256, %s151_s1, [#allocation4]  }
  0x39   :  { %112 = dma.done.wait [#allocation4], 256  }
  0x3a   :  { %113 = vsyncadd [#allocation4], 4294967040 }
  0x3b   :  { %52 = vsyncpa [#allocation3], 1 }
  0x3c   :  { %53 = vsyncpa [#allocation4], 1 }

</bundles_post_ra>
